<compile_context>
chip_gen: v6e
topology: v6e:2x2x1
jax: 0.10.0
libtpu: 0.0.40
codegen_flags: <defaults>
</compile_context>

<pallas_src>
import functools

import jax
import jax.numpy as jnp
from jax.experimental import pallas as pl
from jax.experimental.pallas import tpu as pltpu


# ---------------------------------------------------------------------------
# Kernels
# ---------------------------------------------------------------------------
def _se_fused_kernel(x_ref, w1t_ref, w2_ref, o_ref):
    # x_ref  : (Nb, C, HW)  channel-major tile; HW on lanes, C on sublanes.
    # w1t_ref: (C, hidden)  conv1 weight transposed (contraction dim C on sublanes).
    # w2_ref : (C, hidden)  conv2 weight as-is (contraction dim hidden on lanes).
    x = x_ref[...]                                                  # native dtype

    # Global average pool over the spatial (lane) axis, accumulated in f32.
    pooled = jnp.mean(x, axis=-1, keepdims=True, dtype=jnp.float32)  # (Nb, C, 1)

    # FC1 + ReLU on the VPU: broadcast-multiply + sublane reduction.
    w1t = w1t_ref[...].astype(jnp.float32)[None]                     # (1, C, hidden)
    h = jnp.maximum(jnp.sum(pooled * w1t, axis=1, keepdims=True), 0.0)  # (Nb,1,hid)

    # FC2 + sigmoid: broadcast-multiply + lane reduction; sigmoid -> EUP.
    w2 = w2_ref[...].astype(jnp.float32)[None]                       # (1, C, hidden)
    s = jax.nn.sigmoid(jnp.sum(h * w2, axis=-1, keepdims=True))      # (Nb, C, 1)

    # Rescale in f32 (matches reference precision for sub-f32 inputs); the
    # size-1 lane dim of s broadcasts across HW -> lane-dense store.
    o_ref[...] = (x.astype(jnp.float32) * s).astype(o_ref.dtype)


def _se_pool_scale_kernel(x_ref, w1t_ref, w2_ref, s_ref, acc_ref,
                          *, hw_total, hw_tile, mask_tail):
    # Fallback pass 1: accumulate the spatial sum tile-by-tile, then run the
    # squeeze FCs + sigmoid once at the last spatial tile.
    t = pl.program_id(1)

    @pl.when(t == 0)
    def _():
        acc_ref[...] = jnp.zeros_like(acc_ref)

    x = x_ref[...].astype(jnp.float32)                               # (1, C, hw_tile)
    if mask_tail:
        lane = jax.lax.broadcasted_iota(jnp.int32, x.shape, 2) + t * hw_tile
        x = jnp.where(lane < hw_total, x, 0.0)
    acc_ref[...] += jnp.sum(x, axis=-1, keepdims=True)               # (1, C, 1)

    @pl.when(t == pl.num_programs(1) - 1)
    def _():
        pooled = acc_ref[...] * (1.0 / hw_total)                     # (1, C, 1)
        w1t = w1t_ref[...].astype(jnp.float32)[None]
        h = jnp.maximum(jnp.sum(pooled * w1t, axis=1, keepdims=True), 0.0)
        w2 = w2_ref[...].astype(jnp.float32)[None]
        s_ref[...] = jax.nn.sigmoid(jnp.sum(h * w2, axis=-1, keepdims=True))


def _se_rescale_kernel(s_ref, x_ref, o_ref):
    # Fallback pass 2: per-(n, c) rescale of an HW tile by the f32 gate.
    o_ref[...] = (x_ref[...].astype(jnp.float32) * s_ref[...]).astype(o_ref.dtype)


# ---------------------------------------------------------------------------
# Sizing helpers
# ---------------------------------------------------------------------------
def _vmem_capacity_bytes():
    try:
        cap = getattr(pltpu.get_tpu_info(), "vmem_capacity_bytes", None)
        if cap:
            return int(cap)
    except Exception:
        pass
    return 64 << 20  # conservative default (v7x-sized)


def _pad_up(v, m):
    return -(-v // m) * m


def _sublane_count(dtype):
    # 8 sublanes for 32-bit, 16 for bf16/fp16, 32 for 8-bit types.
    return 8 * max(1, 4 // jnp.dtype(dtype).itemsize)


def _padded_elem_bytes(c, hw, dtype):
    itemsize = jnp.dtype(dtype).itemsize
    return _pad_up(c, _sublane_count(dtype)) * _pad_up(hw, 128) * itemsize


def _pick_block_batch(n, per_elem_bytes, max_block_bytes, *,
                      min_block_bytes, target_steps):
    """Largest batch divisor whose padded block fits max_block_bytes.

    Prefers >= target_steps grid steps (>= 2 per v7x TensorCore), then >= 2,
    but only when each step stays above min_block_bytes; otherwise takes the
    single largest block.  Returns None if even one element doesn't fit.
    """
    fits = [d for d in range(1, n + 1)
            if n % d == 0 and d * per_elem_bytes <= max_block_bytes]
    if not fits:
        return None
    for want_steps in (target_steps, 2, 1):
        cands = [d for d in fits
                 if n // d >= want_steps
                 and (want_steps == 1 or d * per_elem_bytes >= min_block_bytes)]
        if cands:
            return max(cands)
    return max(fits)


# ---------------------------------------------------------------------------
# Wrapper
# ---------------------------------------------------------------------------
def _se_two_pass(x, w1t, w2, max_block_bytes, vmem_soft_cap):
    """HW-tiled fallback for shapes where one batch element exceeds the budget."""
    N, C, HW = x.shape
    hidden = w1t.shape[1]
    dtype = x.dtype
    itemsize = jnp.dtype(dtype).itemsize
    c_pad = _pad_up(C, _sublane_count(dtype))
    hw_pad = _pad_up(HW, 128)

    # Lane-aligned spatial tile fitting the budget (>= 128 lanes).
    hw_tile = (max_block_bytes // (c_pad * itemsize)) // 128 * 128
    hw_tile = int(max(128, min(hw_tile, hw_pad)))
    n_hw = pl.cdiv(HW, hw_tile)
    mask_tail = (HW % hw_tile) != 0

    block_bytes = c_pad * hw_tile * itemsize
    vmem_limit = int(min(max(4 * block_bytes + (2 << 20), 16 << 20), vmem_soft_cap))

    pool_kernel = functools.partial(
        _se_pool_scale_kernel, hw_total=HW, hw_tile=hw_tile, mask_tail=mask_tail)

    # Pass 1: pooled -> FC1 -> ReLU -> FC2 -> sigmoid gate, shape (N, C, 1) f32.
    s = pl.pallas_call(
        pool_kernel,
        out_shape=jax.ShapeDtypeStruct((N, C, 1), jnp.float32),
        grid_spec=pltpu.PrefetchScalarGridSpec(
            num_scalar_prefetch=0,
            grid=(N, n_hw),
            in_specs=[
                pl.BlockSpec((1, C, hw_tile), lambda n, t: (n, 0, t)),
                pl.BlockSpec((C, hidden), lambda n, t: (0, 0)),
                pl.BlockSpec((C, hidden), lambda n, t: (0, 0)),
            ],
            out_specs=pl.BlockSpec((1, C, 1), lambda n, t: (n, 0, 0)),
            scratch_shapes=[pltpu.VMEM((1, C, 1), jnp.float32)],
        ),
        compiler_params=pltpu.CompilerParams(
            dimension_semantics=("parallel", "arbitrary"),
            vmem_limit_bytes=vmem_limit,
        ),
        cost_estimate=pl.CostEstimate(
            flops=int(N * C * HW + 4 * N * C * hidden),
            transcendentals=int(N * C),
            bytes_accessed=int(N * C * HW * itemsize + N * C * 4 + 2 * C * hidden * 4),
        ),
    )(x, w1t, w2)

    # Pass 2: tiled rescale.
    out = pl.pallas_call(
        _se_rescale_kernel,
        out_shape=jax.ShapeDtypeStruct((N, C, HW), dtype),
        grid_spec=pltpu.PrefetchScalarGridSpec(
            num_scalar_prefetch=0,
            grid=(N, n_hw),
            in_specs=[
                pl.BlockSpec((1, C, 1), lambda n, t: (n, 0, 0)),
                pl.BlockSpec((1, C, hw_tile), lambda n, t: (n, 0, t)),
            ],
            out_specs=pl.BlockSpec((1, C, hw_tile), lambda n, t: (n, 0, t)),
        ),
        compiler_params=pltpu.CompilerParams(
            dimension_semantics=("parallel", "parallel"),
            vmem_limit_bytes=vmem_limit,
        ),
        cost_estimate=pl.CostEstimate(
            flops=int(N * C * HW),
            transcendentals=0,
            bytes_accessed=int(2 * N * C * HW * itemsize + N * C * 4),
        ),
    )(s, x)
    return out


def squeeze_excitation(x_nchw, w1, w2, *, max_block_bytes=None):
    """SE forward. x_nchw: (N, C, H, W); w1: (hidden, C); w2: (C, hidden)."""
    N, C, H, W = x_nchw.shape
    hidden = w1.shape[0]
    HW = H * W
    dtype = x_nchw.dtype
    itemsize = jnp.dtype(dtype).itemsize

    # Channel-major (N, C, HW): free reshape of NCHW, no extra HBM passes.
    x = x_nchw.reshape(N, C, HW)
    w1t = jnp.transpose(w1)          # (C, hidden): contraction dim C on sublanes
    # w2 is already (C, hidden): output channel on sublanes, contraction on lanes.

    # Generation-aware block / VMEM budgets.
    vmem_cap = _vmem_capacity_bytes()
    big_vmem = vmem_cap >= (100 << 20)            # v5e/v6e: 128 MiB; v7x: 64 MiB
    if max_block_bytes is None:
        max_block_bytes = (16 << 20) if big_vmem else (12 << 20)
    vmem_soft_cap = (96 << 20) if big_vmem else (56 << 20)

    # Account for sublane (C) and lane (HW) padding so the real VMEM footprint
    # is what we budget for (e.g. HW=49 pads ~2.6x).
    per_elem_padded = _padded_elem_bytes(C, HW, dtype)

    nb = _pick_block_batch(N, per_elem_padded, max_block_bytes,
                           min_block_bytes=2 << 20, target_steps=4)

    if nb is None:
        # One batch element exceeds the budget -> HW-tiled two-pass fallback.
        out = _se_two_pass(x, w1t, w2, max_block_bytes, vmem_soft_cap)
        return out.reshape(N, C, H, W)

    grid_n = N // nb
    block_bytes = nb * per_elem_padded
    # Double-buffered input + output blocks + weights/headroom.
    vmem_limit = int(min(max(4 * block_bytes + (2 << 20), 16 << 20), vmem_soft_cap))

    cost = pl.CostEstimate(
        flops=int(2 * N * C * HW + 4 * N * C * hidden),
        transcendentals=int(N * C),
        bytes_accessed=int(2 * N * C * HW * itemsize + 2 * C * hidden * 4),
    )

    out = pl.pallas_call(
        _se_fused_kernel,
        out_shape=jax.ShapeDtypeStruct((N, C, HW), dtype),
        grid_spec=pltpu.PrefetchScalarGridSpec(
            num_scalar_prefetch=0,
            grid=(grid_n,),
            in_specs=[
                pl.BlockSpec((nb, C, HW), lambda n: (n, 0, 0)),
                pl.BlockSpec((C, hidden), lambda n: (0, 0)),
                pl.BlockSpec((C, hidden), lambda n: (0, 0)),
            ],
            out_specs=pl.BlockSpec((nb, C, HW), lambda n: (n, 0, 0)),
        ),
        compiler_params=pltpu.CompilerParams(
            dimension_semantics=("parallel",),
            vmem_limit_bytes=vmem_limit,
        ),
        cost_estimate=cost,
    )(x, w1t, w2)

    return out.reshape(N, C, H, W)


# ---------------------------------------------------------------------------
# Reference + demo
# ---------------------------------------------------------------------------
def _reference(x, w1, w2):
    pooled = jnp.mean(x.astype(jnp.float32), axis=(2, 3), keepdims=True)  # (N,C,1,1)
    h = jnp.einsum('oc,nchw->nohw', w1.astype(jnp.float32), pooled)
    h = jnp.maximum(h, 0.0)
    s = jax.nn.sigmoid(jnp.einsum('co,nohw->nchw', w2.astype(jnp.float32), h))
    return (x.astype(jnp.float32) * s).astype(x.dtype)


if __name__ == "__main__":
    # SqueezeExcitation(inplanes=16, se_ratio=0.25) -> hidden_dim = 4
    N, C, H, W = 2, 16, 16, 16
    hidden = int(C * 0.25)

    key = jax.random.PRNGKey(0)
    kx, k1, k2 = jax.random.split(key, 3)
    x = jax.random.normal(kx, (N, C, H, W), dtype=jnp.float32)
    # Conv2d weights (kernel_size=1, bias=False): (out, in, 1, 1) squeezed to (out, in).
    w1 = jax.random.normal(k1, (hidden, C), dtype=jnp.float32) * 0.1
    w2 = jax.random.normal(k2, (C, hidden), dtype=jnp.float32) * 0.1

    ref = _reference(x, w1, w2)

    # Fused single-pass path.
    out = jax.block_until_ready(squeeze_excitation(x, w1, w2))
    assert out.shape == (N, C, H, W)
    assert jnp.allclose(out, ref, atol=1e-5, rtol=1e-5), "mismatch vs reference"

    # Also exercise the HW-tiled two-pass fallback by shrinking the block
    # budget below one batch element's footprint.
    out_fb = jax.block_until_ready(
        squeeze_excitation(x, w1, w2, max_block_bytes=8 << 10))
    assert jnp.allclose(out_fb, ref, atol=1e-5, rtol=1e-5), "fallback mismatch"

    print("KERNEL_OK")
</pallas_src>

<mosaic_0001>
module attributes {stable_mosaic.version = 11 : i64} {
  func.func @_se_fused_kernel(%arg0: i32, %arg1: memref<2x16x256xf32, #tpu.memory_space<vmem>>, %arg2: memref<16x4xf32, #tpu.memory_space<vmem>>, %arg3: memref<16x4xf32, #tpu.memory_space<vmem>>, %arg4: memref<2x16x256xf32, #tpu.memory_space<vmem>>) attributes {dimension_semantics = [#tpu.dimension_semantics<parallel>], iteration_bounds = array<i64: 1>, scalar_prefetch = 0 : i64, scratch_operands = 0 : i64, tpu.core_type = #tpu.core_type<tc>, window_params = [{transform_indices = @transform_0, window_bounds = array<i64: 2, 16, 256>}, {pipeline_mode = #tpu.pipeline_mode<synchronous>, transform_indices = @transform_1, window_bounds = array<i64: 16, 4>}, {pipeline_mode = #tpu.pipeline_mode<synchronous>, transform_indices = @transform_2, window_bounds = array<i64: 16, 4>}, {transform_indices = @transform_3, window_bounds = array<i64: 2, 16, 256>}]} {
    %c0 = arith.constant 0 : index
    %c0_0 = arith.constant 0 : index
    %c0_1 = arith.constant 0 : index
    %0 = vector.load %arg1[%c0, %c0_0, %c0_1] : memref<2x16x256xf32, #tpu.memory_space<vmem>>, vector<2x16x256xf32>
    %cst = arith.constant dense<0.000000e+00> : vector<2x16xf32>
    %1 = vector.multi_reduction <add>, %0, %cst [2] : vector<2x16x256xf32> to vector<2x16xf32>
    %2 = vector.shape_cast %1 : vector<2x16xf32> to vector<2x16x1xf32>
    %cst_2 = arith.constant 2.560000e+02 : f32
    %3 = vector.broadcast %cst_2 : f32 to vector<2x16x1xf32>
    %4 = arith.divf %2, %3 : vector<2x16x1xf32>
    %c0_3 = arith.constant 0 : index
    %c0_4 = arith.constant 0 : index
    %5 = vector.load %arg2[%c0_3, %c0_4] : memref<16x4xf32, #tpu.memory_space<vmem>>, vector<16x4xf32>
    %6 = vector.shape_cast %5 : vector<16x4xf32> to vector<1x16x4xf32>
    %7 = vector.broadcast %4 : vector<2x16x1xf32> to vector<2x16x4xf32>
    %8 = vector.broadcast %6 : vector<1x16x4xf32> to vector<2x16x4xf32>
    %9 = arith.mulf %7, %8 : vector<2x16x4xf32>
    %cst_5 = arith.constant dense<0.000000e+00> : vector<2x4xf32>
    %10 = vector.multi_reduction <add>, %9, %cst_5 [1] : vector<2x16x4xf32> to vector<2x4xf32>
    %11 = vector.shape_cast %10 : vector<2x4xf32> to vector<2x1x4xf32>
    %cst_6 = arith.constant 0.000000e+00 : f32
    %12 = vector.broadcast %cst_6 : f32 to vector<2x1x4xf32>
    %13 = arith.maximumf %11, %12 : vector<2x1x4xf32>
    %c0_7 = arith.constant 0 : index
    %c0_8 = arith.constant 0 : index
    %14 = vector.load %arg3[%c0_7, %c0_8] : memref<16x4xf32, #tpu.memory_space<vmem>>, vector<16x4xf32>
    %15 = vector.shape_cast %14 : vector<16x4xf32> to vector<1x16x4xf32>
    %16 = vector.broadcast %13 : vector<2x1x4xf32> to vector<2x16x4xf32>
    %17 = vector.broadcast %15 : vector<1x16x4xf32> to vector<2x16x4xf32>
    %18 = arith.mulf %16, %17 : vector<2x16x4xf32>
    %cst_9 = arith.constant dense<0.000000e+00> : vector<2x16xf32>
    %19 = vector.multi_reduction <add>, %18, %cst_9 [2] : vector<2x16x4xf32> to vector<2x16xf32>
    %20 = vector.shape_cast %19 : vector<2x16xf32> to vector<2x16x1xf32>
    %21 = arith.negf %20 : vector<2x16x1xf32>
    %22 = math.exp %21 : vector<2x16x1xf32>
    %cst_10 = arith.constant 1.000000e+00 : f32
    %23 = vector.broadcast %cst_10 : f32 to vector<2x16x1xf32>
    %24 = arith.addf %23, %22 : vector<2x16x1xf32>
    %25 = arith.divf %23, %24 : vector<2x16x1xf32>
    %26 = vector.broadcast %25 : vector<2x16x1xf32> to vector<2x16x256xf32>
    %27 = arith.mulf %0, %26 : vector<2x16x256xf32>
    %c0_11 = arith.constant 0 : index
    %c0_12 = arith.constant 0 : index
    %c0_13 = arith.constant 0 : index
    %28 = vector.load %arg4[%c0_11, %c0_12, %c0_13] : memref<2x16x256xf32, #tpu.memory_space<vmem>>, vector<2x16x256xf32>
    tpu.vector_store %arg4[%c0_11, %c0_12, %c0_13], %27 {strides = array<i32>} : memref<2x16x256xf32, #tpu.memory_space<vmem>>, vector<2x16x256xf32>,
    return
  }
  func.func @transform_0(%arg0: i32) -> (i32, i32, i32) {
    %c0_i32 = arith.constant 0 : i32
    %c0_i32_0 = arith.constant 0 : i32
    %c0_i32_1 = arith.constant 0 : i32
    return %arg0, %c0_i32, %c0_i32_0 : i32, i32, i32
  }
  func.func @transform_1(%arg0: i32) -> (i32, i32) {
    %c0_i32 = arith.constant 0 : i32
    %c0_i32_0 = arith.constant 0 : i32
    %c0_i32_1 = arith.constant 0 : i32
    return %c0_i32, %c0_i32_0 : i32, i32
  }
  func.func @transform_2(%arg0: i32) -> (i32, i32) {
    %c0_i32 = arith.constant 0 : i32
    %c0_i32_0 = arith.constant 0 : i32
    %c0_i32_1 = arith.constant 0 : i32
    return %c0_i32, %c0_i32_0 : i32, i32
  }
  func.func @transform_3(%arg0: i32) -> (i32, i32, i32) {
    %c0_i32 = arith.constant 0 : i32
    %c0_i32_0 = arith.constant 0 : i32
    %c0_i32_1 = arith.constant 0 : i32
    return %arg0, %c0_i32, %c0_i32_0 : i32, i32, i32
  }
}

</mosaic_0001>

<bundles_post_ra>
// kernel: tpu_custom_call.1
= control target key start
LH: loop header
LB: loop body
LE: loop exit
PB: predicated region body
PF: predicated region fallthrough
CT: control target
= control target key end

     0   :  { %8 = vsyncpa [#allocation3], 0  ;;  %s312_s0 = inlined_call_operand.hbm [shape: f32[2,16,256], index: 0, kind: input, shape index: {}]   ;;  %s313_s1 = inlined_call_operand.vmem [shape: f32[16,4], index: 1, kind: input, shape index: {}]   ;;  %s314_s2 = inlined_call_operand.vmem [shape: f32[16,4], index: 2, kind: input, shape index: {}]   ;;  %s315_s3 = inlined_call_operand.hbm [shape: f32[2,16,256], index: 3, kind: output, shape index: {}]  }
   0x1   :  { %9 = vsyncpa [#allocation4], 0  ;;  %s224_s12 = smov [#allocation2]  }
   0x2   :  { %s15_s13 = sshll.u32 %s224_s12, 4  ;;  %s16_s13 = int_to_ptr.vmem [resolvable:$true] %s15_s13 }
   0x3   :  { %s188_s14 = scalar_lea.vmem %s16_s13, 1024  ;;  %p193_p1 = scmp.lt.s32.totalorder %s16_s13, %s16_s13 }
   0x4   :  { %p189_p0 = scmp.ne.s32.totalorder %s16_s13, %s188_s14  ;;  %p194_p2 = scmp.lt.s32.totalorder %s188_s14, %s188_s14 }
   0x6   :  { %p195_p3 = por %p194_p2, %p193_p1 }
   0x8   :  { %p196_p4 = pnand %p195_p3, %p189_p0 }
   0xa   :  { %199 = shalt.err (!%p196_p4)
}
   0xb   :  { %s225_s15 = smov 256   ;;  %s226_s16 = smov 16  }
   0xc   :  { %21 = dma.hbm_to_vmem [thread:$0]  %s312_s0, 1024, %s16_s13, [#allocation3], %s225_s15, %s225_s15, %s226_s16  }
   0xd   :  { %220 = dma.done.wait [#allocation3], 1024  }
   0xe   :  { %221 = vsyncadd [#allocation3], 4294966272  ;;  %v254_v0 = vld [vmem:[#allocation2 + $0x20] sm:$0xff]  ;;  %v256_v1 = vld [vmem:[#allocation2 + $0x28] sm:$0xff]  ;;  %vm60_vm0 = vcmask 31744  }
   0xf   :  { %v258_v2 = vld [vmem:[#allocation2] sm:$0xff]  ;;  %v43_v3 = vadd.f32 %v256_v1, %v254_v0  ;;  %v262_v4 = vld [vmem:[#allocation2 + $0x8] sm:$0xff]  ;;  %v264_v5 = vld [vmem:[#allocation2 + $0x30] sm:$0xff] }
  0x10   :  { %v266_v6 = vld [vmem:[#allocation2 + $0x38] sm:$0xff]  ;;  %v37_v7 = vadd.f32 %v262_v4, %v258_v2  ;;  %v270_v8 = vld [vmem:[#allocation2 + $0x10] sm:$0xff]  ;;  %v54_v15 = vld [vmem:[%s313_s1] sm:$0xff] }
  0x11   :  { %v272_v9 = vld [vmem:[#allocation2 + $0x18] sm:$0xff]  ;;  %44 = vadd.xlane.f32.xlu1 %v43_v3  ;;  %v46_v10 = vadd.f32 %v266_v6, %v264_v5  ;;  %v55_v18 = vld [vmem:[%s313_s1 + $0x8] sm:$0xff]  ;;  %v81_v45 = vld [vmem:[%s314_s2] sm:$0xff] }
  0x12   :  { %38 = vadd.xlane.f32.xlu0 %v37_v7  ;;  %v40_v11 = vadd.f32 %v272_v9, %v270_v8  ;;  %v82_v44 = vld [vmem:[%s314_s2 + $0x8] sm:$0xff]  ;;  %s227_s2 = smov [#allocation5]  }
  0x13   :  { %s144_s25 = sshll.u32 %s227_s2, 4  ;;  %s145_s25 = int_to_ptr.vmem [resolvable:$true] %s144_s25 }
  0x14   :  { %s200_s26 = scalar_lea.vmem %s145_s25, 1024  ;;  %p205_p6 = scmp.lt.s32.totalorder %s145_s25, %s145_s25 }
  0x15   :  { %47 = vadd.xlane.f32.xlu1 %v46_v10  ;;  %p201_p5 = scmp.ne.s32.totalorder %s145_s25, %s200_s26  ;;  %p206_p7 = scmp.lt.s32.totalorder %s200_s26, %s200_s26 }
  0x16   :  { %41 = vadd.xlane.f32.xlu0 %v40_v11 }
  0x17   :  { %p207_p8 = por %p206_p7, %p205_p6 }
  0x19   :  { %p208_p9 = pnand %p207_p8, %p201_p5 }
  0x9a   :  { %v45_v12 = vpop.xlane.xlu1 %44 }
  0x9b   :  { %v52_v13 = vmul.f32 0.00390625, %v45_v12  ;;  %v39_v14 = vpop.xlane.xlu0 %38 }
  0x9c   :  { %v50_v16 = vmul.f32 0.00390625, %v39_v14 }
  0x9d   :  { %v58_v17 = vmul.f32 %v54_v15, %v52_v13 }
  0x9e   :  { %v48_v19 = vpop.xlane.xlu1 %47  ;;  %v56_v22 = vmul.f32 %v54_v15, %v50_v16 }
  0x9f   :  { %v53_v20 = vmul.f32 0.00390625, %v48_v19  ;;  %v42_v21 = vpop.xlane.xlu0 %41  ;;  %v70_v24 = vsel %vm60_vm0, %v58_v17, 0.0 }
  0xa0   :  { %v51_v23 = vmul.f32 0.00390625, %v42_v21  ;;  %v61_v28 = vsel %vm60_vm0, %v56_v22, 0.0 }
  0xa1   :  { %v59_v25 = vmul.f32 %v55_v18, %v53_v20 }
  0xa2   :  { %v57_v26 = vmul.f32 %v55_v18, %v51_v23 }
  0xa3   :  { %v71_v27 = vsel %vm60_vm0, %v59_v25, 0.0 }
  0xa4   :  { %v72_v29 = vadd.f32 %v71_v27, %v70_v24  ;;  %v62_v30 = vsel %vm60_vm0, %v57_v26, 0.0 }
  0xa5   :  { %v63_v31 = vadd.f32 %v62_v30, %v61_v28 }
  0xa6   :  { %v73_v32 = vrot.slane %v72_v29, 4 }
  0xa7   :  { %v64_v33 = vrot.slane %v63_v31, 4 }
  0xa8   :  { %v74_v34 = vadd.f32 %v73_v32, %v72_v29 }
  0xa9   :  { %v65_v35 = vadd.f32 %v64_v33, %v63_v31 }
  0xaa   :  { %v75_v36 = vrot.slane %v74_v34, 2 }
  0xab   :  { %v66_v37 = vrot.slane %v65_v35, 2 }
  0xac   :  { %v76_v38 = vadd.f32 %v75_v36, %v74_v34 }
  0xad   :  { %v67_v39 = vadd.f32 %v66_v37, %v65_v35 }
  0xae   :  { %v77_v40 = vrot.slane %v76_v38, 1 }
  0xaf   :  { %v68_v41 = vrot.slane %v67_v39, 1 }
  0xb0   :  { %v78_v42 = vadd.f32 %v77_v40, %v76_v38 }
  0xb1   :  { %v69_v43 = vadd.f32 %v68_v41, %v67_v39 }
  0xb2   :  { %v80_v47 = vmax.f32 %v78_v42, 0.0 }
  0xb3   :  { %v79_v46 = vmax.f32 %v69_v43, 0.0 }
  0xb4   :  { %v86_v52 = vmul.f32 %v82_v44, %v80_v47  ;;  %v85_v53 = vmul.f32 %v81_v45, %v80_v47 }
  0xb5   :  { %v84_v48 = vmul.f32 %v82_v44, %v79_v46  ;;  %v83_v49 = vmul.f32 %v81_v45, %v79_v46 }
  0xb6   :  { %v96_v54 = vsel %vm60_vm0, %v86_v52, 0.0  ;;  %v93_v55 = vsel %vm60_vm0, %v85_v53, 0.0 }
  0xb7   :  { %v90_v50 = vsel %vm60_vm0, %v84_v48, 0.0  ;;  %v87_v51 = vsel %vm60_vm0, %v83_v49, 0.0 }
  0xb8   :  { %91 = vadd.xlane.f32.xlu1 %v90_v50  ;;  %88 = vadd.xlane.f32.xlu0 %v87_v51 }
  0xbc   :  { %97 = vadd.xlane.f32.xlu1 %v96_v54  ;;  %94 = vadd.xlane.f32.xlu0 %v93_v55 }
 0x141   :  { %v92_v56 = vpop.xlane.xlu1 %91  ;;  %v89_v57 = vpop.xlane.xlu0 %88 }
 0x142   :  { %v157_v58 = vmul.f32 -1.442695, %v92_v56  ;;  %v156_v59 = vmul.f32 -1.442695, %v89_v57 }
 0x144   :  { %164 = vpow2.f32 %v157_v58 }
 0x145   :  { %166 = vpow2.f32 %v156_v59  ;;  %v98_v60 = vpop.xlane.xlu1 %97  ;;  %v95_v61 = vpop.xlane.xlu0 %94 }
 0x146   :  { %v159_v62 = vmul.f32 -1.442695, %v98_v60  ;;  %v158_v63 = vmul.f32 -1.442695, %v95_v61 }
 0x148   :  { %168 = vpow2.f32 %v159_v62 }
 0x149   :  { %170 = vpow2.f32 %v158_v63 }
 0x151   :  { %v165_v3 = vpop.eup %164 }
 0x152   :  { %v167_v7 = vpop.eup %166  ;;  %v112_v10 = vadd.f32 1.0, %v165_v3 }
 0x153   :  { %v111_v11 = vadd.f32 1.0, %v167_v7 }
 0x154   :  { %172 = vrcp.f32 %v112_v10 }
 0x155   :  { %v169_v12 = vpop.eup %168  ;;  %174 = vrcp.f32 %v111_v11 }
 0x156   :  { %v171_v13 = vpop.eup %170  ;;  %v114_v14 = vadd.f32 1.0, %v169_v12 }
 0x157   :  { %v113_v15 = vadd.f32 1.0, %v171_v13 }
 0x158   :  { %176 = vrcp.f32 %v114_v14 }
 0x159   :  { %178 = vrcp.f32 %v113_v15 }
 0x161   :  { %v173_v16 = vpop.eup %172 }
 0x162   :  { %v175_v17 = vpop.eup %174  ;;  %v125_v18 = vmul.f32 %v173_v16, %v270_v8  ;;  %v126_v19 = vmul.f32 %v173_v16, %v272_v9 }
 0x163   :  { %v123_v20 = vmul.f32 %v175_v17, %v258_v2  ;;  %v124_v21 = vmul.f32 %v175_v17, %v262_v4 }
 0x164   :  { %133 = vst [vmem:[#allocation5 + $0x10] sm:$0xff] %v125_v18  ;;  %134 = vst [vmem:[#allocation5 + $0x18] sm:$0xff] %v126_v19 }
 0x165   :  { %v177_v22 = vpop.eup %176  ;;  %131 = vst [vmem:[#allocation5] sm:$0xff] %v123_v20  ;;  %132 = vst [vmem:[#allocation5 + $0x8] sm:$0xff] %v124_v21 }
 0x166   :  { %v179_v23 = vpop.eup %178  ;;  %v129_v24 = vmul.f32 %v177_v22, %v264_v5  ;;  %v130_v25 = vmul.f32 %v177_v22, %v266_v6 }
 0x167   :  { %v127_v8 = vmul.f32 %v179_v23, %v254_v0  ;;  %v128_v9 = vmul.f32 %v179_v23, %v256_v1 }
 0x168   :  { %137 = vst [vmem:[#allocation5 + $0x30] sm:$0xff] %v129_v24  ;;  %138 = vst [vmem:[#allocation5 + $0x38] sm:$0xff] %v130_v25 }
 0x169   :  { %135 = vst [vmem:[#allocation5 + $0x20] sm:$0xff] %v127_v8  ;;  %136 = vst [vmem:[#allocation5 + $0x28] sm:$0xff] %v128_v9 }
 0x16a   :  { %211 = shalt.err (!%p208_p9)
}
 0x16b   :  { %150 = dma.vmem_to_hbm [thread:$0]  %s145_s25, 1024, %s315_s3, [#allocation4], %s225_s15, %s225_s15, %s226_s16  }
 0x16c   :  { %222 = dma.done.wait [#allocation4], 1024  }
 0x16d   :  { %223 = vsyncadd [#allocation4], 4294966272 }
 0x16e   :  { %154 = vsyncpa [#allocation3], 1 }
 0x16f   :  { %155 = vsyncpa [#allocation4], 1 }

</bundles_post_ra>
